<compile_context>
chip_gen: v5e
topology: v5e:2x2
jax: 0.10.0
libtpu: 0.0.40
codegen_flags: <defaults>
</compile_context>

<pallas_src>
import functools
import math

import jax
import jax.numpy as jnp
from jax.experimental import pallas as pl
from jax.experimental.pallas import tpu as pltpu


# ---------------------------------------------------------------------------
# Kernel 1: common-neighbour aggregation  xcns = (adj_i * adj_j) @ x_aug
# ---------------------------------------------------------------------------
def _cn_agg_kernel(ai_ref, aj_ref, xa_ref, out_ref):
    k = pl.program_id(1)

    @pl.when(k == 0)
    def _():
        out_ref[...] = jnp.zeros_like(out_ref)

    # adjacency tiles arrive as bf16 (exact for 0/1); accumulate in f32.
    cn = ai_ref[...].astype(jnp.float32) * aj_ref[...].astype(jnp.float32)
    out_ref[...] += jnp.dot(cn, xa_ref[...], preferred_element_type=jnp.float32)


# ---------------------------------------------------------------------------
# Kernel 2: fused MLP head (eval mode: Dropout = Identity, LayerNorm = Identity)
# ---------------------------------------------------------------------------
def _head_kernel(xi_ref, xj_ref, xcns_ref,
                 wc1_ref, bc1_ref, wc2_ref, bc2_ref, wc3_ref, bc3_ref,
                 wj1_ref, bj1_ref, wj2_ref, bj2_ref,
                 wl1_ref, bl1_ref, wl2t_ref, fin_ref,
                 out_ref, *, d):
    fin = fin_ref[...]                       # (1, 8): [beta, bl2, wf0, wf1, wf2, bf, 0, 0]
    beta = fin[:, 0:1]
    bl2 = fin[:, 1:2]
    wf0, wf1, wf2, bf = fin[:, 2:3], fin[:, 3:4], fin[:, 4:5], fin[:, 5:6]

    xi = xi_ref[...]
    xj = xj_ref[...]
    xij_e = xi * xj                                            # (te, D)
    xij_score = jnp.sum(xij_e, axis=-1, keepdims=True)         # (te, 1)

    xcns = xcns_ref[...]                                       # (te, DP); cols >= d+1 are 0
    cn_score = xcns[:, d:d + 1]                                # (te, 1)

    # xcnlin: Linear(D+1,H) -> ReLU -> Linear(H,H) -> ReLU -> Linear(H,H)
    h = jnp.maximum(jnp.dot(xcns, wc1_ref[...],
                            preferred_element_type=jnp.float32) + bc1_ref[...], 0.0)
    h = jnp.maximum(jnp.dot(h, wc2_ref[...],
                            preferred_element_type=jnp.float32) + bc2_ref[...], 0.0)
    xcn = jnp.dot(h, wc3_ref[...], preferred_element_type=jnp.float32) + bc3_ref[...]

    # xijlin: Linear(D,H) -> ReLU -> Linear(H,H)
    g = jnp.maximum(jnp.dot(xij_e, wj1_ref[...],
                            preferred_element_type=jnp.float32) + bj1_ref[...], 0.0)
    xij = jnp.dot(g, wj2_ref[...], preferred_element_type=jnp.float32) + bj2_ref[...]

    # lin: Linear(H,H) -> ReLU -> Linear(H,1); the skinny (H,1) matmul is done as
    # a broadcast-multiply + lane reduce to avoid a 1-wide MXU output.
    z = xcn * beta + xij
    l1 = jnp.maximum(jnp.dot(z, wl1_ref[...],
                             preferred_element_type=jnp.float32) + bl1_ref[...], 0.0)
    xs = jnp.sum(l1 * wl2t_ref[...], axis=-1, keepdims=True) + bl2   # (te, 1)

    # final_lin over concat([xs, xij_score, cn_score]) expressed with scalar weights.
    out_ref[...] = wf0 * xs + wf1 * xij_score + wf2 * cn_score + bf


# ---------------------------------------------------------------------------
# Wrapper
# ---------------------------------------------------------------------------
def _round_up(v, m):
    return ((v + m - 1) // m) * m


def _pad2(a, rows, cols):
    r, c = a.shape
    if r == rows and c == cols:
        return a
    return jnp.pad(a, ((0, rows - r), (0, cols - c)))


def cn1_link_predictor_forward(x, adj, tar_ei, params, *, te=128, tk=256, dp=128,
                               vmem_limit_bytes=64 * 1024 * 1024):
    """CN1LinkPredictor.forward (eval mode) with dense 0/1 adjacency."""
    N, D = x.shape
    E = tar_ei.shape[1]
    H = params["wc2"].shape[0]
    assert dp >= D + 1 and dp % 128 == 0

    # TODO(synk): data-dependent row gathers (x[tar_ei], adj[tar_ei]) and the
    # training-only DropAdj / nn.Dropout branches stay in XLA (identity in eval).
    xi = jnp.take(x, tar_ei[0], axis=0)                          # (E, D)
    xj = jnp.take(x, tar_ei[1], axis=0)                          # (E, D)
    adj_i = jnp.take(adj, tar_ei[0], axis=0).astype(jnp.bfloat16)  # (E, N) 0/1 exact
    adj_j = jnp.take(adj, tar_ei[1], axis=0).astype(jnp.bfloat16)  # (E, N)

    # x_aug = [x | ones | zero-pad]: column D of (cn @ x_aug) is cn_score; the zero
    # pad keeps the output lane-dense (128 wide) at no numerical cost.
    x_aug = jnp.zeros((N, dp), jnp.float32)
    x_aug = x_aug.at[:, :D].set(x).at[:, D].set(1.0)

    # Pad ragged edge / node counts up to tile multiples (zeros are exact no-ops).
    e_pad = _round_up(E, te)
    n_pad = _round_up(N, tk)
    adj_i_p = _pad2(adj_i, e_pad, n_pad)
    adj_j_p = _pad2(adj_j, e_pad, n_pad)
    x_aug_p = _pad2(x_aug, n_pad, dp)
    xi_p = _pad2(xi, e_pad, D)
    xj_p = _pad2(xj, e_pad, D)

    # ---- Pass 1: xcns_pad[e, :] = sum_k (adj_i[e,k] * adj_j[e,k]) * x_aug[k, :] ----
    xcns = pl.pallas_call(
        _cn_agg_kernel,
        out_shape=jax.ShapeDtypeStruct((e_pad, dp), jnp.float32),
        grid_spec=pltpu.PrefetchScalarGridSpec(
            num_scalar_prefetch=0,
            grid=(e_pad // te, n_pad // tk),          # reduction (node) axis last
            in_specs=[pl.BlockSpec((te, tk), lambda e, k: (e, k)),   # adj_i tile (bf16)
                      pl.BlockSpec((te, tk), lambda e, k: (e, k)),   # adj_j tile (bf16)
                      pl.BlockSpec((tk, dp), lambda e, k: (k, 0))],  # x_aug K tile
            out_specs=pl.BlockSpec((te, dp), lambda e, k: (e, 0))),  # resident accumulator
        compiler_params=pltpu.CompilerParams(
            dimension_semantics=("parallel", "arbitrary"),
            vmem_limit_bytes=vmem_limit_bytes),
    )(adj_i_p, adj_j_p, x_aug_p)

    # ---- Pass 2: fused MLP head over edge row tiles ----
    wc1_p = _pad2(params["wc1"], dp, H)               # zero rows beyond D+1 (exact)
    wl2t = params["wl2"].reshape(1, H)                # (H,1) -> (1,H) for mul+reduce
    fin = jnp.concatenate([params["beta"].reshape(1), params["bl2"].reshape(1),
                           params["wf"].reshape(-1), params["bf"].reshape(1),
                           jnp.zeros((2,), jnp.float32)]).reshape(1, 8)

    row = lambda e: (e, 0)
    full = lambda e: (0, 0)
    out = pl.pallas_call(
        functools.partial(_head_kernel, d=D),
        out_shape=jax.ShapeDtypeStruct((e_pad, 1), jnp.float32),
        grid_spec=pltpu.PrefetchScalarGridSpec(
            num_scalar_prefetch=0,
            grid=(e_pad // te,),
            in_specs=[pl.BlockSpec((te, D), row),      # xi tile
                      pl.BlockSpec((te, D), row),      # xj tile
                      pl.BlockSpec((te, dp), row),     # xcns tile
                      pl.BlockSpec((dp, H), full),     # xcnlin W1 (padded)
                      pl.BlockSpec((1, H), full),      # xcnlin b1
                      pl.BlockSpec((H, H), full),      # xcnlin W2
                      pl.BlockSpec((1, H), full),      # xcnlin b2
                      pl.BlockSpec((H, H), full),      # xcnlin W3
                      pl.BlockSpec((1, H), full),      # xcnlin b3
                      pl.BlockSpec((D, H), full),      # xijlin W1
                      pl.BlockSpec((1, H), full),      # xijlin b1
                      pl.BlockSpec((H, H), full),      # xijlin W2
                      pl.BlockSpec((1, H), full),      # xijlin b2
                      pl.BlockSpec((H, H), full),      # lin W1
                      pl.BlockSpec((1, H), full),      # lin b1
                      pl.BlockSpec((1, H), full),      # lin W2 (transposed)
                      pl.BlockSpec((1, 8), full)],     # [beta, bl2, wf0..2, bf]
            out_specs=pl.BlockSpec((te, 1), row)),
        compiler_params=pltpu.CompilerParams(
            dimension_semantics=("parallel",),
            vmem_limit_bytes=vmem_limit_bytes),
    )(xi_p, xj_p, xcns,
      wc1_p, params["bc1"], params["wc2"], params["bc2"], params["wc3"], params["bc3"],
      params["wj1"], params["bj1"], params["wj2"], params["bj2"],
      params["wl1"], params["bl1"], wl2t, fin)

    return out[:E]


# ---------------------------------------------------------------------------
# Pure-JAX reference mirroring the PyTorch forward (eval mode)
# ---------------------------------------------------------------------------
def cn1_link_predictor_ref(x, adj, tar_ei, params):
    relu = jax.nn.relu
    xi = x[tar_ei[0]]
    xj = x[tar_ei[1]]
    # TODO(synk): adjoverlap filled1=True / weighted adjacency / cndeg>0 sampling
    # paths are not implemented; this is the default filled1=False binary case.
    cn = adj[tar_ei[0]] * adj[tar_ei[1]]
    cn_score = cn.sum(-1, keepdims=True)
    xij_score = (xi * xj).sum(-1, keepdims=True)
    xcns = jnp.concatenate([cn @ x, cn_score], axis=-1)
    h = relu(xcns @ params["wc1"] + params["bc1"])
    h = relu(h @ params["wc2"] + params["bc2"])
    xcn = h @ params["wc3"] + params["bc3"]
    g = relu((xi * xj) @ params["wj1"] + params["bj1"])
    xij = g @ params["wj2"] + params["bj2"]
    z = xcn * params["beta"] + xij
    l1 = relu(z @ params["wl1"] + params["bl1"])
    xs = l1 @ params["wl2"] + params["bl2"]
    final = jnp.concatenate([xs, xij_score, cn_score], axis=-1)
    return final @ params["wf"] + params["bf"]


# ---------------------------------------------------------------------------
# Deterministic parameter init (PyTorch nn.Linear-style uniform)
# ---------------------------------------------------------------------------
def _init_linear(key, fan_in, fan_out):
    kw, kb = jax.random.split(key)
    bound = 1.0 / math.sqrt(fan_in)
    w = jax.random.uniform(kw, (fan_in, fan_out), jnp.float32, -bound, bound)
    b = jax.random.uniform(kb, (1, fan_out), jnp.float32, -bound, bound)
    return w, b


def init_params(key, d, h, beta=1.0):
    keys = jax.random.split(key, 8)
    wc1, bc1 = _init_linear(keys[0], d + 1, h)   # xcnlin
    wc2, bc2 = _init_linear(keys[1], h, h)
    wc3, bc3 = _init_linear(keys[2], h, h)
    wj1, bj1 = _init_linear(keys[3], d, h)       # xijlin
    wj2, bj2 = _init_linear(keys[4], h, h)
    wl1, bl1 = _init_linear(keys[5], h, h)       # lin
    wl2, bl2 = _init_linear(keys[6], h, 1)
    wf, bf = _init_linear(keys[7], 3, 1)         # final_lin
    return dict(wc1=wc1, bc1=bc1, wc2=wc2, bc2=bc2, wc3=wc3, bc3=bc3,
                wj1=wj1, bj1=bj1, wj2=wj2, bj2=bj2,
                wl1=wl1, bl1=bl1, wl2=wl2, bl2=bl2[0, 0],
                wf=wf, bf=bf[0, 0],
                beta=jnp.asarray(beta, jnp.float32))


if __name__ == "__main__":
    # Small shapes; N and E deliberately NOT tile multiples to exercise padding.
    N, D, H, E = 500, 32, 32, 200
    key = jax.random.PRNGKey(0)
    k_adj, k_x, k_ei, k_p = jax.random.split(key, 4)

    adj = jax.random.bernoulli(k_adj, p=0.05, shape=(N, N)).astype(jnp.float32)
    adj = jnp.maximum(adj, adj.T)            # undirected 0/1 adjacency
    adj = adj * (1.0 - jnp.eye(N, dtype=jnp.float32))  # no self loops
    x = jax.random.normal(k_x, (N, D), dtype=jnp.float32)
    tar_ei = jax.random.randint(k_ei, (2, E), 0, N, dtype=jnp.int32)

    params = init_params(k_p, D, H)

    out = cn1_link_predictor_forward(x, adj, tar_ei, params, te=128, tk=256)
    out = jax.block_until_ready(out)

    ref = cn1_link_predictor_ref(x, adj, tar_ei, params)
    assert out.shape == (E, 1)
    assert jnp.allclose(out, ref, atol=2e-3, rtol=2e-3), float(jnp.max(jnp.abs(out - ref)))
    print("KERNEL_OK")
</pallas_src>

<mosaic_0001>
module attributes {stable_mosaic.version = 11 : i64} {
  func.func @_cn_agg_kernel(%arg0: i32, %arg1: i32, %arg2: memref<128x256xbf16, #tpu.memory_space<vmem>>, %arg3: memref<128x256xbf16, #tpu.memory_space<vmem>>, %arg4: memref<256x128xf32, #tpu.memory_space<vmem>>, %arg5: memref<128x128xf32, #tpu.memory_space<vmem>>) attributes {dimension_semantics = [#tpu.dimension_semantics<parallel>, #tpu.dimension_semantics<arbitrary>], iteration_bounds = array<i64: 2, 2>, scalar_prefetch = 0 : i64, scratch_operands = 0 : i64, tpu.core_type = #tpu.core_type<tc>, window_params = [{transform_indices = @transform_0, window_bounds = array<i64: 128, 256>}, {transform_indices = @transform_1, window_bounds = array<i64: 128, 256>}, {transform_indices = @transform_2, window_bounds = array<i64: 256, 128>}, {transform_indices = @transform_3, window_bounds = array<i64: 128, 128>}]} {
    %c0_i32 = arith.constant 0 : i32
    %0 = arith.cmpi eq, %arg1, %c0_i32 : i32
    %1 = arith.extui %0 : i1 to i32
    %c0_i32_0 = arith.constant 0 : i32
    %2 = arith.cmpi ne, %1, %c0_i32_0 : i32
    scf.if %2 {
      %cst_10 = arith.constant 0.000000e+00 : f32
      %13 = vector.broadcast %cst_10 : f32 to vector<128x128xf32>
      %c0_11 = arith.constant 0 : index
      %c0_12 = arith.constant 0 : index
      %14 = vector.load %arg5[%c0_11, %c0_12] : memref<128x128xf32, #tpu.memory_space<vmem>>, vector<128x128xf32>
      tpu.vector_store %arg5[%c0_11, %c0_12], %13 {strides = array<i32>} : memref<128x128xf32, #tpu.memory_space<vmem>>, vector<128x128xf32>,
    } else {
    }
    %c0 = arith.constant 0 : index
    %c0_1 = arith.constant 0 : index
    %3 = vector.load %arg2[%c0, %c0_1] : memref<128x256xbf16, #tpu.memory_space<vmem>>, vector<128x256xbf16>
    %4 = arith.extf %3 : vector<128x256xbf16> to vector<128x256xf32>
    %c0_2 = arith.constant 0 : index
    %c0_3 = arith.constant 0 : index
    %5 = vector.load %arg3[%c0_2, %c0_3] : memref<128x256xbf16, #tpu.memory_space<vmem>>, vector<128x256xbf16>
    %6 = arith.extf %5 : vector<128x256xbf16> to vector<128x256xf32>
    %7 = arith.mulf %4, %6 : vector<128x256xf32>
    %c0_4 = arith.constant 0 : index
    %c0_5 = arith.constant 0 : index
    %8 = vector.load %arg5[%c0_4, %c0_5] : memref<128x128xf32, #tpu.memory_space<vmem>>, vector<128x128xf32>
    %c0_6 = arith.constant 0 : index
    %c0_7 = arith.constant 0 : index
    %9 = vector.load %arg4[%c0_6, %c0_7] : memref<256x128xf32, #tpu.memory_space<vmem>>, vector<256x128xf32>
    %cst = arith.constant dense<0.000000e+00> : vector<128x128xf32>
    %10 = tpu.matmul %7, %9, %cst {dimension_numbers = #tpu.dot_dimension_numbers<[1], [0], [0], [1], [0, 0, 1, 1], [], []>} : vector<128x256xf32>, vector<256x128xf32>, vector<128x128xf32> -> vector<128x128xf32>
    %11 = arith.addf %8, %10 : vector<128x128xf32>
    %c0_8 = arith.constant 0 : index
    %c0_9 = arith.constant 0 : index
    %12 = vector.load %arg5[%c0_8, %c0_9] : memref<128x128xf32, #tpu.memory_space<vmem>>, vector<128x128xf32>
    tpu.vector_store %arg5[%c0_8, %c0_9], %11 {strides = array<i32>} : memref<128x128xf32, #tpu.memory_space<vmem>>, vector<128x128xf32>,
    return
  }
  func.func @transform_0(%arg0: i32, %arg1: i32) -> (i32, i32) {
    %c0_i32 = arith.constant 0 : i32
    return %arg0, %arg1 : i32, i32
  }
  func.func @transform_1(%arg0: i32, %arg1: i32) -> (i32, i32) {
    %c0_i32 = arith.constant 0 : i32
    return %arg0, %arg1 : i32, i32
  }
  func.func @transform_2(%arg0: i32, %arg1: i32) -> (i32, i32) {
    %c0_i32 = arith.constant 0 : i32
    %c0_i32_0 = arith.constant 0 : i32
    return %arg1, %c0_i32 : i32, i32
  }
  func.func @transform_3(%arg0: i32, %arg1: i32) -> (i32, i32) {
    %c0_i32 = arith.constant 0 : i32
    %c0_i32_0 = arith.constant 0 : i32
    return %arg0, %c0_i32 : i32, i32
  }
}

</mosaic_0001>

<bundles_post_ra>
// kernel: tpu_custom_call.1
= control target key start
LH: loop header
LB: loop body
LE: loop exit
PB: predicated region body
PF: predicated region fallthrough
CT: control target
= control target key end

     0   :  { %s1685_s0 = inlined_call_operand.hbm [shape: bf16[256,512], index: 0, kind: input, shape index: {}]   ;;  %s1686_s1 = inlined_call_operand.hbm [shape: bf16[256,512], index: 1, kind: input, shape index: {}]   ;;  %s1687_s2 = inlined_call_operand.hbm [shape: f32[512,128], index: 2, kind: input, shape index: {}]   ;;  %s1688_s3 = inlined_call_operand.hbm [shape: f32[256,128], index: 3, kind: output, shape index: {}]  }
   0x1   :  { %1699 = sst [smem:[#allocation24_spill]] %s1686_s1 }
   0x2   :  { %1700 = sst [smem:[#allocation25_spill]] %s1688_s3 }
   0x3   :  { %8 = vsyncpa [#allocation3], 0 }
   0x4   :  { %10 = vsyncpa [#allocation3 + $0x1], 0 }
   0x5   :  { %11 = vsyncpa [#allocation6], 0 }
   0x6   :  { %13 = vsyncpa [#allocation6 + $0x1], 0 }
   0x7   :  { %14 = vsyncpa [#allocation4], 0 }
   0x8   :  { %16 = vsyncpa [#allocation4 + $0x1], 0  ;;  %s1285_s12 = smov 0   ;;  %s1287_s13 = smov 0  }
   0x9   :  { %s1289_s14 = smov 0   ;;  %s1291_s15 = smov 0  }
   0xa   :  { %s1293_s16 = smov 0   ;;  %s1295_s17 = smov 0  }
   0xb   :  { %s1297_s18 = smov 0   ;;  %s1299_s19 = smov 0  }
   0xc   :  { %s1301_s20 = smov 0   ;;  %s1303_s21 = smov 0  }
   0xd   :  { %s1305_s22 = smov 0   ;;  %s1307_s23 = smov 0  }
   0xe   :  { %s1309_s24 = smov 0   ;;  %s1311_s25 = smov 0  }
   0xf LB: > { %1701 = sst [smem:[#allocation13_spill]] %s1205_s12  ;;  %s1354_s26 = sadd.s32 4294967295, %s1257_s25   ;;  %s1257_s25 = sphi %s1311_s25, %s22_s25   ;;  %s1253_s24 = sphi %s1309_s24, %s1742_s24   ;;  %s1249_s23 = sphi %s1307_s23, %s1741_s23   ;;  %s1245_s22 = sphi %s1305_s22, %s1730_s22   ;;  %s1241_s21 = sphi %s1303_s21, %s1740_s21   ;;  %s1237_s20 = sphi %s1301_s20, %s1729_s20   ;;  %s1233_s19 = sphi %s1299_s19, %s1739_s19   ;;  %s1229_s18 = sphi %s1297_s18, %s1738_s18   ;;  %s1225_s17 = sphi %s1295_s17, %s1737_s17   ;;  %s1221_s16 = sphi %s1293_s16, %s1736_s16   ;;  %s1217_s15 = sphi %s1291_s15, %s1735_s15   ;;  %s1213_s14 = sphi %s1289_s14, %s1727_s14   ;;  %s1209_s13 = sphi %s1287_s13, %s1734_s13   ;;  %s1205_s12 = sphi %s1285_s12, %s1733_s12  }
  0x10   : > { %1702 = sst [smem:[#allocation14_spill]] %s1213_s14  ;;  %s808_s27 = sadd.s32 4294967294, %s1257_s25  }
  0x11   : > { %1703 = sst [smem:[#allocation15_spill]] %s1237_s20  ;;  %s31_s28 = sadd.s32 1, %s1249_s23 }
  0x12   : > { %1704 = sst [smem:[#allocation16_spill]] %s1245_s22  ;;  %s34_s29 = sadd.s32 1, %s1253_s24 }
  0x13   : > { %1705 = sst [smem:[#allocation17_spill]] %s1253_s24  ;;  %p32_p0 = scmp.ge.s32.totalorder %s31_s28, 2 }
  0x14   : > { %s43_s30 = sadd.s32 1, %s1237_s20  ;;  %p50_p1 = scmp.ne.s32.totalorder %s1237_s20, %s1233_s19 }
  0x15   : > { %p51_p2 = scmp.eq.s32.totalorder %s1257_s25, 0  ;;  %s1744_s28 = smov (%p32_p0, %s31_s28), 0 }
  0x16   : > { %1706 = sst [smem:[#allocation18_spill]] %s1744_s28  ;;  %s1746_s29 = smov (!%p32_p0, %s34_s29), %s1253_s24 }
  0x17   : > { %s1368_s4 = ssub.s32 %s1249_s23, %s1744_s28  ;;  %p1372_p3 = por %p51_p2, %p50_p1 }
  0x18   : > { %p36_p4 = scmp.ge.s32.totalorder %s1746_s29, 2  ;;  %p56_p5 = scmp.ne.s32.totalorder %s1233_s19, %s1229_s18 }
  0x19   : > { %p57_p6 = scmp.eq.s32.totalorder %s1354_s26, 0  ;;  %p95_p7 = scmp.eq.s32.totalorder %s1368_s4, 0 }
  0x1a   : > { %s1748_s29 = smov (%p36_p4, %s1746_s29), 0  ;;  %s123_s7 = sadd.s32 1, %s1213_s14 }
  0x1b   : > { %1708 = sst [smem:[#allocation19_spill]] %s1748_s29  ;;  %p1383_p8 = por %p57_p6, %p56_p5 }
  0x1c   : > { %s38_s8 = ssub.s32 %s1253_s24, %s1748_s29  ;;  %p133_p9 = scmp.ne.s32.totalorder %s1213_s14, %s1209_s13 }
  0x1d   : > { %s40_s9 = sor.u32 %s1368_s4, %s38_s8  ;;  %p121_p10 = scmp.eq.s32.totalorder %s38_s8, 0 }
  0x1e   : > { %p41_p11 = scmp.eq.s32.totalorder %s40_s9, 0  ;;  %p134_p12 = scmp.eq.s32.totalorder %s1354_s26, 3 }
  0x1f   : > { %s1395_s10 = scalar_select %p121_p10, %s1213_s14, %s123_s7  }
  0x20   : > { %s1398_s11 = scalar_select %p41_p11, %s1237_s20, %s43_s30  }
  0x21   : > { %1710 = sst [smem:[#allocation20_spill]] %s1395_s10  ;;  %p1400_p13 = por %p134_p12, %p133_p9 }
  0x22   : > { %1711 = sst [smem:[#allocation21_spill]] %s1398_s11  ;;  %p139_p0 = scmp.ne.s32.totalorder %s1209_s13, %s1205_s12 }
  0x23   : > { %s1712_s18 = scalar_select %p1400_p13, 1, 0 }
  0x24   : > { %p140_p1 = scmp.eq.s32.totalorder %s808_s27, 3  ;;  %p893_p4 = scmp.lt.s32.totalorder %s1257_s25, 4 }
  0x25   : > { %1713 = sst [smem:[#allocation22_spill]] %s1712_s18  ;;  %s160_s29 = sand.u32 1, %s1237_s20  }
  0x26   : > { %p1408_p5 = por %p140_p1, %p139_p0  ;;  %s811_s8 = sshll.u32 %s160_s29, 7 }
  0x27   : > { %s813_s9 = sshll.u32 %s1249_s23, 1  ;;  %s835_s3 = sshll.u32 %s1253_s24, 6 }
  0x28   : > { %s1714_s28 = scalar_select %p1408_p5, 1, 0 }
  0x29   : > { %s170_s7 = sadd.s32 %s835_s3, %s813_s9  ;;  %p1418_p9 = pnand %p893_p4, %p1372_p3 }
  0x2a   : > { %1715 = sst [smem:[#allocation23_spill]] %s1714_s28  ;;  %s815_s27 = sshll.u32 %s170_s7, 2 }
  0x2b   : > { %s185_s11 = sand.u32 1, %s1257_s25   ;;  %s1717_s1 = sld [smem:[#allocation24_spill]] }
  0x2c   : > { %s189_s12 = scalar_lea.vmem [#allocation5], %s811_s8  ;;  %p824_p10 = scmp.ge.s32.totalorder %s1257_s25, 1 }
  0x2d   : > { %s200_s28 = sshll.u32 %s189_s12, 4  ;;  %s1427_s3 = scalar_lea.sflag [#allocation6], %s185_s11  ;;  %s201_s28 = int_to_ptr.vmem [resolvable:$true] %s200_s28 }
  0x2e   : > { %s1259_s5 = smov 256   ;;  %s1260_s9 = smov 128  }
  0x2f   : > { %s1261_s20 = smov 8   ;;  %p230_p3 = scmp.lt.s32.totalorder %s1257_s25, 5 }
  0x30   : > { %s172_s11 = scalar_lea.hbm %s1685_s0, %s815_s27  ;;  %s164_s7 = scalar_lea.vmem [#allocation2], %s811_s8 }
  0x31   : > { %s197_s14 = scalar_lea.hbm %s1717_s1, %s815_s27  ;;  %p1435_p11 = pnand %p824_p10, %p230_p3 }
  0x32   : > { %s198_s18 = sshll.u32 %s197_s14, 4  ;;  %s175_s1 = sshll.u32 %s164_s7, 4  ;;  %s199_s18 = int_to_ptr.hbm [resolvable:$true] %s198_s18  ;;  %s176_s1 = int_to_ptr.vmem [resolvable:$true] %s175_s1 }
  0x33   : > { %885 = dma.hbm_to_vmem [thread:$0]  (!%p1418_p9), %s199_s18, 2048, %s201_s28, %s1427_s3, %s1259_s5, %s1260_s9, %s1261_s20  }
  0x34   : > { %s173_s24 = sshll.u32 %s172_s11, 4  ;;  %s161_s22 = scalar_lea.sflag [#allocation3], %s160_s29  ;;  %s174_s24 = int_to_ptr.hbm [resolvable:$true] %s173_s24 }
  0x35   : > { %882 = dma.hbm_to_vmem [thread:$0]  (!%p1418_p9), %s174_s24, 2048, %s176_s1, %s161_s22, %s1259_s5, %s1260_s9, %s1261_s20  }
  0x36   : > { %s97_s28 = sadd.s32 1, %s1225_s17  ;;  %p104_p12 = scmp.ne.s32.totalorder %s1225_s17, %s1221_s16 }
  0x37   : > { %s1450_s18 = scalar_select %p95_p7, %s1225_s17, %s97_s28  }
  0x38   : > { %p110_p0 = scmp.ne.s32.totalorder %s1221_s16, %s1217_s15  ;;  %s212_s14 = sand.u32 1, %s1225_s17  }
  0x39   : > { %s837_s27 = sshll.u32 %s1249_s23, 8  ;;  %p106_p1 = por %p104_p12, %p51_p2 }
  0x3a   : > { %p1462_p10 = por %p110_p0, %p57_p6  ;;  %s821_s29 = sshll.u32 %s212_s14, 8 }
  0x3b   : > { %s219_s22 = scalar_lea.hbm %s1687_s2, %s837_s27  ;;  %s214_s4 = scalar_lea.vmem [#allocation7], %s821_s29 }
  0x3c   : > { %s220_s24 = sshll.u32 %s219_s22, 4  ;;  %s222_s5 = sshll.u32 %s214_s4, 4  ;;  %s221_s24 = int_to_ptr.hbm [resolvable:$true] %s220_s24  ;;  %s223_s5 = int_to_ptr.vmem [resolvable:$true] %s222_s5 }
  0x3d   : > { %p886_p7 = pnand %p893_p4, %p106_p1  ;;  %234 = sbr.rel (%p1435_p11) target bundleno = 327 (0x147), region = 32 }
  0x3e   : > { %s236_s15 = sand.u32 (!%p1435_p11), 1, %s1233_s19  }
  0x3f   : > { %888 = dma.hbm_to_vmem [thread:$0]  (!%p886_p7), %s221_s24, 4096, %s223_s5, %s1427_s3, %s1260_s9, %s1260_s9, %s1261_s20  }
  0x40   : > { %s825_s10 = sshll.u32 (!%p1435_p11), %s236_s15, 7  ;;  %s237_s11 = scalar_lea.sflag (!%p1435_p11), [#allocation3], %s236_s15 }
  0x41   : > { %s1478_s7 = scalar_lea.vmem (!%p1435_p11), [#allocation2], %s825_s10 }
  0x42   : > { %1188 = dma.done.wait (%p1383_p8), %s237_s11, 2048  }
  0x43   : > { %1190 = vsyncadd (%p1383_p8), %s237_s11, 4294965248  ;;  %s246_s28 = sand.u32 1, %s1354_s26   ;;  %s1485_s3 = scalar_lea.vmem [#allocation5], %s825_s10 }
  0x44   : > { %s247_s14 = scalar_lea.sflag [#allocation6], %s246_s28 }
  0x45   : > { %1192 = dma.done.wait (%p1383_p8), %s247_s14, 2048  }
  0x46   : > { %1194 = vsyncadd (%p1383_p8), %s247_s14, 4294965248  ;;  %s258_s9 = sand.u32 1, %s1221_s16  }
  0x47   : > { %s827_s20 = sshll.u32 %s258_s9, 8 }
  0x48   : > { %s1492_s12 = scalar_lea.vmem [#allocation7], %s827_s20 }
  0x49   : > { %1196 = dma.done.wait (%p1462_p10), %s247_s14, 4096  }
  0x4a   : > { %1198 = vsyncadd (%p1462_p10), %s247_s14, 4294963200  ;;  %s291_s26 = sand.u32 1, %s1209_s13   ;;  %p829_p2 = scmp.ne.s32.totalorder %s1241_s21, 0 }
  0x4b   : > { %s828_s27 = sshll.u32 %s291_s26, 7 }
  0x4c   : > { %s1501_s29 = scalar_lea.vmem [#allocation8], %s828_s27  ;;  %303 = sbr.rel (%p829_p2) target bundleno = 98 (0x62), region = 48 }
  0x51   : > { %v1262_v0 = vmov 0.0  }
  0x52   : > { %304 = vst [vmem:[%s1501_s29] sm:$0xff] %v1262_v0 }
  0x53   : > { %305 = vst [vmem:[%s1501_s29 + $0x8] sm:$0xff] %v1262_v0 }
  0x54   : > { %306 = vst [vmem:[%s1501_s29 + $0x10] sm:$0xff] %v1262_v0 }
  0x55   : > { %307 = vst [vmem:[%s1501_s29 + $0x18] sm:$0xff] %v1262_v0 }
  0x56   : > { %308 = vst [vmem:[%s1501_s29 + $0x20] sm:$0xff] %v1262_v0 }
  0x57   : > { %309 = vst [vmem:[%s1501_s29 + $0x28] sm:$0xff] %v1262_v0 }
  0x58   : > { %310 = vst [vmem:[%s1501_s29 + $0x30] sm:$0xff] %v1262_v0 }
  0x59   : > { %311 = vst [vmem:[%s1501_s29 + $0x38] sm:$0xff] %v1262_v0 }
  0x5a   : > { %312 = vst [vmem:[%s1501_s29 + $0x40] sm:$0xff] %v1262_v0 }
  0x5b   : > { %313 = vst [vmem:[%s1501_s29 + $0x48] sm:$0xff] %v1262_v0 }
  0x5c   : > { %314 = vst [vmem:[%s1501_s29 + $0x50] sm:$0xff] %v1262_v0 }
  0x5d   : > { %315 = vst [vmem:[%s1501_s29 + $0x58] sm:$0xff] %v1262_v0 }
  0x5e   : > { %316 = vst [vmem:[%s1501_s29 + $0x60] sm:$0xff] %v1262_v0 }
  0x5f   : > { %317 = vst [vmem:[%s1501_s29 + $0x68] sm:$0xff] %v1262_v0 }
  0x60   : > { %318 = vst [vmem:[%s1501_s29 + $0x70] sm:$0xff] %v1262_v0 }
  0x61   : > { %319 = vst [vmem:[%s1501_s29 + $0x78] sm:$0xff] %v1262_v0 }
  0x62 PF: > { %v479_v1 = vld [vmem:[%s1492_s12 + $0x78] sm:$0xff]  ;;  %v478_v3 = vld [vmem:[%s1492_s12 + $0x70] sm:$0xff]  ;;  %v477_v5 = vld [vmem:[%s1492_s12 + $0x68] sm:$0xff]  ;;  %s1720_s21 = sld [smem:[#allocation16_spill]]  ;;  %s671_s24 = sshll.u32 %s1501_s29, 4  ;;  %s672_s24 = int_to_ptr.vmem [resolvable:$true] %s671_s24 }
  0x63   : > { %v495_v2 = vld [vmem:[%s1492_s12 + $0xf8] sm:$0xff]  ;;  %839 = vmatpush.msra.mxu2 %v479_v1  ;;  %v494_v4 = vld [vmem:[%s1492_s12 + $0xf0] sm:$0xff]  ;;  %v493_v6 = vld [vmem:[%s1492_s12 + $0xe8] sm:$0xff]  ;;  %496 = vmatpush.msra.mxu0 %v479_v1  ;;  %s1721_s1 = sld [smem:[#allocation25_spill]]  ;;  %s659_s15 = scalar_lea.sflag [#allocation4], %s291_s26 }
  0x64   : > { %855 = vmatpush.msra.mxu3 %v495_v2  ;;  %561 = vmatpush.msra.mxu1 %v495_v2  ;;  %v476_v7 = vld [vmem:[%s1492_s12 + $0x60] sm:$0xff]  ;;  %v475_v9 = vld [vmem:[%s1492_s12 + $0x58] sm:$0xff]  ;;  %v474_v11 = vld [vmem:[%s1492_s12 + $0x50] sm:$0xff] }
  0x65   : > { %840 = vmatpush.msra.mxu2 %v478_v3  ;;  %v492_v8 = vld [vmem:[%s1492_s12 + $0xe0] sm:$0xff]  ;;  %497 = vmatpush.msra.mxu0 %v478_v3  ;;  %v491_v10 = vld [vmem:[%s1492_s12 + $0xd8] sm:$0xff]  ;;  %v490_v12 = vld [vmem:[%s1492_s12 + $0xd0] sm:$0xff] }
  0x66   : > { %856 = vmatpush.msra.mxu3 %v494_v4  ;;  %562 = vmatpush.msra.mxu1 %v494_v4  ;;  %v473_v13 = vld [vmem:[%s1492_s12 + $0x48] sm:$0xff]  ;;  %v472_v15 = vld [vmem:[%s1492_s12 + $0x40] sm:$0xff]  ;;  %v471_v17 = vld [vmem:[%s1492_s12 + $0x38] sm:$0xff] }
  0x67   : > { %841 = vmatpush.msra.mxu2 %v477_v5  ;;  %498 = vmatpush.msra.mxu0 %v477_v5  ;;  %v489_v14 = vld [vmem:[%s1492_s12 + $0xc8] sm:$0xff]  ;;  %v488_v16 = vld [vmem:[%s1492_s12 + $0xc0] sm:$0xff]  ;;  %v487_v18 = vld [vmem:[%s1492_s12 + $0xb8] sm:$0xff] }
  0x68   : > { %857 = vmatpush.msra.mxu3 %v493_v6  ;;  %563 = vmatpush.msra.mxu1 %v493_v6  ;;  %v470_v19 = vld [vmem:[%s1492_s12 + $0x30] sm:$0xff]  ;;  %v469_v21 = vld [vmem:[%s1492_s12 + $0x28] sm:$0xff]  ;;  %v468_v23 = vld [vmem:[%s1492_s12 + $0x20] sm:$0xff]  ;;  %s838_s6 = sshll.u32 %s1720_s21, 7 }
  0x69   : > { %842 = vmatpush.msra.mxu2 %v476_v7  ;;  %499 = vmatpush.msra.mxu0 %v476_v7  ;;  %v486_v20 = vld [vmem:[%s1492_s12 + $0xb0] sm:$0xff]  ;;  %v485_v22 = vld [vmem:[%s1492_s12 + $0xa8] sm:$0xff]  ;;  %v484_v24 = vld [vmem:[%s1492_s12 + $0xa0] sm:$0xff]  ;;  %s670_s22 = scalar_lea.hbm %s1721_s1, %s838_s6  ;;  %s1123_s14 = scalar_lea.hbm %s1721_s1, 256 }
  0x6a   : > { %858 = vmatpush.msra.mxu3 %v492_v8  ;;  %564 = vmatpush.msra.mxu1 %v492_v8  ;;  %v328_v25 = vld [vmem:[%s1478_s7 + $0x40] sm:$0xff]  ;;  %v467_v27 = vld [vmem:[%s1492_s12 + $0x18] sm:$0xff]  ;;  %v466_v31 = vld [vmem:[%s1492_s12 + $0x10] sm:$0xff]  ;;  %s673_s5 = sshll.u32 %s670_s22, 4  ;;  %s674_s5 = int_to_ptr.hbm [resolvable:$true] %s673_s5 }
  0x6b   : > { %843 = vmatpush.msra.mxu2 %v475_v9  ;;  %500 = vmatpush.msra.mxu0 %v475_v9  ;;  %v376_v26 = vld [vmem:[%s1485_s3 + $0x40] sm:$0xff]  ;;  %v483_v28 = vld [vmem:[%s1492_s12 + $0x98] sm:$0xff]  ;;  %v482_v32 = vld [vmem:[%s1492_s12 + $0x90] sm:$0xff]  ;;  %v352_v33 = vunpack.c.l.bf16 %v328_v25  ;;  %v353_v35 = vunpack.c.h.bf16 %v328_v25  ;;  %s1117_s10 = sshra.s32 %s674_s5, 4  ;;  %s1118_s10 = int_to_ptr.hbm [resolvable:$true] %s1117_s10 }
  0x6c   : > { %859 = vmatpush.msra.mxu3 %v491_v10  ;;  %565 = vmatpush.msra.mxu1 %v491_v10  ;;  %v320_v29 = vld [vmem:[%s1478_s7] sm:$0xff]  ;;  %v400_v34 = vunpack.c.l.bf16 %v376_v26  ;;  %v401_v36 = vunpack.c.h.bf16 %v376_v26  ;;  %v465_v37 = vld [vmem:[%s1492_s12 + $0x8] sm:$0xff]  ;;  %v330_v63 = vld [vmem:[%s1478_s7 + $0x50] sm:$0xff]  ;;  %s1119_s11 = scalar_lea.hbm %s1118_s10, 128  ;;  %p1124_p9 = scmp.lt.s32.totalorder %s1118_s10, %s1721_s1 }
  0x6d   : > { %844 = vmatpush.msra.mxu2 %v474_v11  ;;  %501 = vmatpush.msra.mxu0 %v474_v11  ;;  %v368_v30 = vld [vmem:[%s1485_s3] sm:$0xff]  ;;  %v481_v38 = vld [vmem:[%s1492_s12 + $0x88] sm:$0xff]  ;;  %v336_v39 = vunpack.c.l.bf16 %v320_v29  ;;  %v337_v41 = vunpack.c.h.bf16 %v320_v29  ;;  %v378_v0 = vld [vmem:[%s1485_s3 + $0x50] sm:$0xff]  ;;  %v356_v5 = vunpack.c.l.bf16 %v330_v63  ;;  %v357_v7 = vunpack.c.h.bf16 %v330_v63  ;;  %p1120_p6 = scmp.ne.s32.totalorder %s1118_s10, %s1119_s11  ;;  %p1125_p3 = scmp.lt.s32.totalorder %s1123_s14, %s1119_s11 }
  0x6e   : > { %860 = vmatpush.msra.mxu3 %v490_v12  ;;  %566 = vmatpush.msra.mxu1 %v490_v12  ;;  %v384_v40 = vunpack.c.l.bf16 %v368_v30  ;;  %v385_v42 = vunpack.c.h.bf16 %v368_v30  ;;  %v464_v43 = vld [vmem:[%s1492_s12] sm:$0xff]  ;;  %v432_v45 = vmul.f32 %v400_v34, %v352_v33  ;;  %v433_v46 = vmul.f32 %v401_v36, %v353_v35  ;;  %v329_v47 = vld [vmem:[%s1478_s7 + $0x48] sm:$0xff]  ;;  %v322_v3 = vld [vmem:[%s1478_s7 + $0x10] sm:$0xff] }
  0x6f   : > { %845 = vmatpush.msra.mxu2 %v473_v13  ;;  %502 = vmatpush.msra.mxu0 %v473_v13  ;;  %v480_v44 = vld [vmem:[%s1492_s12 + $0x80] sm:$0xff]  ;;  %v377_v48 = vld [vmem:[%s1485_s3 + $0x48] sm:$0xff]  ;;  %v354_v53 = vunpack.c.l.bf16 %v329_v47  ;;  %v355_v55 = vunpack.c.h.bf16 %v329_v47  ;;  %v370_v4 = vld [vmem:[%s1485_s3 + $0x10] sm:$0xff]  ;;  %v404_v6 = vunpack.c.l.bf16 %v378_v0  ;;  %v405_v8 = vunpack.c.h.bf16 %v378_v0  ;;  %p1121_p8 = pnand %p1120_p6, %p1400_p13  ;;  %p1126_p11 = por %p1125_p3, %p1124_p9 }
  0x70   : > { %861 = vmatpush.msra.mxu3 %v489_v14  ;;  %567 = vmatpush.msra.mxu1 %v489_v14  ;;  %v416_v49 = vmul.f32 %v384_v40, %v336_v39  ;;  %v417_v50 = vmul.f32 %v385_v42, %v337_v41  ;;  %v321_v51 = vld [vmem:[%s1478_s7 + $0x8] sm:$0xff]  ;;  %v402_v54 = vunpack.c.l.bf16 %v377_v48  ;;  %v403_v56 = vunpack.c.h.bf16 %v377_v48  ;;  %v324_v35 = vld [vmem:[%s1478_s7 + $0x20] sm:$0xff]  ;;  %v334_v63 = vld [vmem:[%s1478_s7 + $0x70] sm:$0xff] }
  0x71   : > { %846 = vmatpush.msra.mxu2 %v472_v15  ;;  %503 = vmatpush.msra.mxu0 %v472_v15  ;;  %v369_v52 = vld [vmem:[%s1485_s3 + $0x8] sm:$0xff]  ;;  %v338_v57 = vunpack.c.l.bf16 %v321_v51  ;;  %v339_v59 = vunpack.c.h.bf16 %v321_v51  ;;  %v340_v9 = vunpack.c.l.bf16 %v322_v3  ;;  %v388_v10 = vunpack.c.l.bf16 %v370_v4  ;;  %v331_v15 = vld [vmem:[%s1478_s7 + $0x58] sm:$0xff]  ;;  %v372_v36 = vld [vmem:[%s1485_s3 + $0x20] sm:$0xff]  ;;  %p1122_p4 = pneg %p1121_p8 }
  0x72   : > { %862 = vmatpush.msra.mxu3 %v488_v16  ;;  %568 = vmatpush.msra.mxu1 %v488_v16  ;;  %v386_v58 = vunpack.c.l.bf16 %v369_v52  ;;  %v387_v60 = vunpack.c.h.bf16 %v369_v52  ;;  %v434_v61 = vmul.f32 %v402_v54, %v354_v53  ;;  %v435_v62 = vmul.f32 %v403_v56, %v355_v55  ;;  %v379_v16 = vld [vmem:[%s1485_s3 + $0x58] sm:$0xff]  ;;  %v333_v47 = vld [vmem:[%s1478_s7 + $0x68] sm:$0xff]  ;;  %v382_v0 = vld [vmem:[%s1485_s3 + $0x70] sm:$0xff] }
  0x73   : > { %847 = vmatpush.msra.mxu2 %v471_v17  ;;  %504 = vmatpush.msra.mxu0 %v471_v17  ;;  %v341_v11 = vunpack.c.h.bf16 %v322_v3  ;;  %v389_v12 = vunpack.c.h.bf16 %v370_v4  ;;  %v436_v13 = vmul.f32 %v404_v6, %v356_v5  ;;  %v437_v14 = vmul.f32 %v405_v8, %v357_v7  ;;  %v381_v48 = vld [vmem:[%s1485_s3 + $0x68] sm:$0xff]  ;;  %v326_v3 = vld [vmem:[%s1478_s7 + $0x30] sm:$0xff]  ;;  %p1127_p12 = pnand %p1126_p11, %p1122_p4 }
  0x74   : > { %863 = vmatpush.msra.mxu3 %v487_v18  ;;  %569 = vmatpush.msra.mxu1 %v487_v18  ;;  %v418_v1 = vmul.f32 %v386_v58, %v338_v57  ;;  %v419_v2 = vmul.f32 %v387_v60, %v339_v59  ;;  %v420_v17 = vmul.f32 %v388_v10, %v340_v9  ;;  %v344_v41 = vunpack.c.l.bf16 %v324_v35  ;;  %v325_v51 = vld [vmem:[%s1478_s7 + $0x28] sm:$0xff]  ;;  %v374_v4 = vld [vmem:[%s1485_s3 + $0x30] sm:$0xff] }
  0x75   : > { %848 = vmatpush.msra.mxu2 %v470_v19  ;;  %505 = vmatpush.msra.mxu0 %v470_v19  ;;  %v421_v18 = vmul.f32 %v389_v12, %v341_v11  ;;  %v323_v19 = vld [vmem:[%s1478_s7 + $0x18] sm:$0xff]  ;;  %v392_v42 = vunpack.c.l.bf16 %v372_v36  ;;  %v373_v52 = vld [vmem:[%s1485_s3 + $0x28] sm:$0xff]  ;;  %v362_v53 = vunpack.c.l.bf16 %v333_v47  ;;  %v410_v54 = vunpack.c.l.bf16 %v381_v48 }
  0x76   : > { %864 = vmatpush.msra.mxu3 %v486_v20  ;;  %570 = vmatpush.msra.mxu1 %v486_v20  ;;  %v371_v20 = vld [vmem:[%s1485_s3 + $0x18] sm:$0xff]  ;;  %v342_v25 = vunpack.c.l.bf16 %v323_v19  ;;  %v363_v55 = vunpack.c.h.bf16 %v333_v47  ;;  %v411_v56 = vunpack.c.h.bf16 %v381_v48  ;;  %v346_v57 = vunpack.c.l.bf16 %v325_v51 }
  0x77   : > { %849 = vmatpush.msra.mxu2 %v469_v21  ;;  %506 = vmatpush.msra.mxu0 %v469_v21  ;;  %v358_v21 = vunpack.c.l.bf16 %v331_v15  ;;  %v390_v26 = vunpack.c.l.bf16 %v371_v20  ;;  %v394_v58 = vunpack.c.l.bf16 %v373_v52  ;;  %v347_v59 = vunpack.c.h.bf16 %v325_v51 }
  0x78   : > { %865 = vmatpush.msra.mxu3 %v485_v22  ;;  %571 = vmatpush.msra.mxu1 %v485_v22  ;;  %v406_v22 = vunpack.c.l.bf16 %v379_v16  ;;  %v395_v60 = vunpack.c.h.bf16 %v373_v52  ;;  %v364_v5 = vunpack.c.l.bf16 %v334_v63  ;;  %v412_v6 = vunpack.c.l.bf16 %v382_v0 }
  0x79   : > { %850 = vmatpush.msra.mxu2 %v468_v23  ;;  %507 = vmatpush.msra.mxu0 %v468_v23  ;;  %v359_v23 = vunpack.c.h.bf16 %v331_v15  ;;  %v422_v33 = vmul.f32 %v390_v26, %v342_v25  ;;  %v365_v7 = vunpack.c.h.bf16 %v334_v63  ;;  %v413_v8 = vunpack.c.h.bf16 %v382_v0  ;;  %v335_v15 = vld [vmem:[%s1478_s7 + $0x78] sm:$0xff] }
  0x7a   : > { %866 = vmatpush.msra.mxu3 %v484_v24  ;;  %572 = vmatpush.msra.mxu1 %v484_v24  ;;  %v407_v24 = vunpack.c.h.bf16 %v379_v16  ;;  %v438_v29 = vmul.f32 %v406_v22, %v358_v21  ;;  %v348_v9 = vunpack.c.l.bf16 %v326_v3  ;;  %v396_v10 = vunpack.c.l.bf16 %v374_v4  ;;  %v383_v16 = vld [vmem:[%s1485_s3 + $0x78] sm:$0xff] }
  0x7b   : > { %851 = vmatpush.msra.mxu2 %v467_v27  ;;  %508 = vmatpush.msra.mxu0 %v467_v27  ;;  %v343_v27 = vunpack.c.h.bf16 %v323_v19  ;;  %v349_v11 = vunpack.c.h.bf16 %v326_v3  ;;  %v397_v12 = vunpack.c.h.bf16 %v374_v4  ;;  %v327_v19 = vld [vmem:[%s1478_s7 + $0x38] sm:$0xff]  ;;  %v366_v21 = vunpack.c.l.bf16 %v335_v15 }
  0x7c   : > { %867 = vmatpush.msra.mxu3 %v483_v28  ;;  %573 = vmatpush.msra.mxu1 %v483_v28  ;;  %v391_v28 = vunpack.c.h.bf16 %v371_v20  ;;  %v439_v30 = vmul.f32 %v407_v24, %v359_v23  ;;  %v375_v20 = vld [vmem:[%s1485_s3 + $0x38] sm:$0xff]  ;;  %v414_v22 = vunpack.c.l.bf16 %v383_v16  ;;  %v367_v23 = vunpack.c.h.bf16 %v335_v15  ;;  %v460_v15 = vld [vmem:[%s1501_s29 + $0x60] sm:$0xff] }
  0x7d   : > { %852 = vmatpush.msra.mxu2 %v466_v31  ;;  %509 = vmatpush.msra.mxu0 %v466_v31  ;;  %v332_v31 = vld [vmem:[%s1478_s7 + $0x60] sm:$0xff]  ;;  %v415_v24 = vunpack.c.h.bf16 %v383_v16  ;;  %v350_v25 = vunpack.c.l.bf16 %v327_v19  ;;  %v398_v26 = vunpack.c.l.bf16 %v375_v20  ;;  %v451_v0 = vld [vmem:[%s1501_s29 + $0x18] sm:$0xff] }
  0x7e   : > { %868 = vmatpush.msra.mxu3 %v482_v32  ;;  %574 = vmatpush.msra.mxu1 %v482_v32  ;;  %v380_v32 = vld [vmem:[%s1485_s3 + $0x60] sm:$0xff]  ;;  %v423_v34 = vmul.f32 %v391_v28, %v343_v27  ;;  %v361_v39 = vunpack.c.h.bf16 %v332_v31  ;;  %v351_v27 = vunpack.c.h.bf16 %v327_v19  ;;  %v399_v28 = vunpack.c.h.bf16 %v375_v20  ;;  %v453_v20 = vld [vmem:[%s1501_s29 + $0x28] sm:$0xff] }
  0x7f   : > { %853 = vmatpush.msra.mxu2 %v465_v37  ;;  %510 = vmatpush.msra.mxu0 %v465_v37  ;;  %v360_v37 = vunpack.c.l.bf16 %v332_v31  ;;  %v409_v40 = vunpack.c.h.bf16 %v380_v32  ;;  %v430_v31 = vmul.f32 %v398_v26, %v350_v25  ;;  %v461_v25 = vld [vmem:[%s1501_s29 + $0x68] sm:$0xff] }
  0x80   : > { %869 = vmatpush.msra.mxu3 %v481_v38  ;;  %575 = vmatpush.msra.mxu1 %v481_v38  ;;  %v408_v38 = vunpack.c.l.bf16 %v380_v32  ;;  %v431_v32 = vmul.f32 %v399_v28, %v351_v27 }
  0x81   : > { %854 = vmatpush.msra.mxu2 %v464_v43  ;;  %511 = vmatpush.msra.mxu0 %v464_v43  ;;  %v345_v43 = vunpack.c.h.bf16 %v324_v35 }
  0x82   : > { %870 = vmatpush.msra.mxu3 %v480_v44  ;;  %536 = vmatmul.f32.vlgmr.msra.gmra.mxu2 %v432_v45  ;;  %v440_v45 = vmul.f32 %v408_v38, %v360_v37 }
  0x83   : > { %601 = vmatmul.f32.vlgmr.msra.gmra.mxu3 %v433_v46  ;;  %576 = vmatpush.msra.mxu1 %v480_v44  ;;  %v393_v44 = vunpack.c.h.bf16 %v372_v36  ;;  %v441_v46 = vmul.f32 %v409_v40, %v361_v39  ;;  %v456_v39 = vld [vmem:[%s1501_s29 + $0x40] sm:$0xff] }
  0x84   : > { %512 = vmatmul.f32.vlgmr.msra.gmra.mxu0 %v416_v49  ;;  %577 = vmatmul.f32.vlgmr.msra.gmra.mxu1 %v417_v50  ;;  %v424_v49 = vmul.f32 %v392_v42, %v344_v41 }
  0x85   : > { %v425_v50 = vmul.f32 %v393_v44, %v345_v43  ;;  %v449_v44 = vld [vmem:[%s1501_s29 + $0x8] sm:$0xff] }
  0x8a   : > { %539 = vmatmul.f32.gmra.mxu2 %v434_v61  ;;  %v442_v61 = vmul.f32 %v410_v54, %v362_v53  ;;  %v450_v54 = vld [vmem:[%s1501_s29 + $0x10] sm:$0xff] }
  0x8b   : > { %604 = vmatmul.f32.gmra.mxu3 %v435_v62  ;;  %v443_v62 = vmul.f32 %v411_v56, %v363_v55 }
  0x8c   : > { %515 = vmatmul.f32.gmra.mxu0 %v418_v1  ;;  %580 = vmatmul.f32.gmra.mxu1 %v419_v2  ;;  %v426_v1 = vmul.f32 %v394_v58, %v346_v57  ;;  %v427_v2 = vmul.f32 %v395_v60, %v347_v59  ;;  %v458_v59 = vld [vmem:[%s1501_s29 + $0x50] sm:$0xff] }
  0x92   : > { %542 = vmatmul.f32.gmra.mxu2 %v436_v13  ;;  %v444_v13 = vmul.f32 %v412_v6, %v364_v5  ;;  %v459_v5 = vld [vmem:[%s1501_s29 + $0x58] sm:$0xff] }
  0x93   : > { %607 = vmatmul.f32.gmra.mxu3 %v437_v14  ;;  %v445_v14 = vmul.f32 %v413_v8, %v365_v7 }
  0x94   : > { %518 = vmatmul.f32.gmra.mxu0 %v420_v17  ;;  %583 = vmatmul.f32.gmra.mxu1 %v421_v18  ;;  %v428_v17 = vmul.f32 %v396_v10, %v348_v9  ;;  %v429_v18 = vmul.f32 %v397_v12, %v349_v11  ;;  %v452_v10 = vld [vmem:[%s1501_s29 + $0x20] sm:$0xff] }
  0x9a   : > { %545 = vmatmul.f32.gmra.mxu2 %v438_v29  ;;  %v446_v29 = vmul.f32 %v414_v22, %v366_v21 }
  0x9b   : > { %610 = vmatmul.f32.gmra.mxu3 %v439_v30  ;;  %v447_v30 = vmul.f32 %v415_v24, %v367_v23 }
  0x9c   : > { %521 = vmatmul.f32.gmra.mxu0 %v422_v33  ;;  %586 = vmatmul.f32.gmra.mxu1 %v423_v34  ;;  %v448_v34 = vld [vmem:[%s1501_s29] sm:$0xff] }
  0xa2   : > { %548 = vmatmul.f32.gmra.mxu2 %v440_v45 }
  0xa3   : > { %613 = vmatmul.f32.gmra.mxu3 %v441_v46 }
  0xa4   : > { %524 = vmatmul.f32.gmra.mxu0 %v424_v49  ;;  %589 = vmatmul.f32.gmra.mxu1 %v425_v50  ;;  %v457_v49 = vld [vmem:[%s1501_s29 + $0x48] sm:$0xff] }
  0xaa   : > { %551 = vmatmul.f32.gmra.mxu2 %v442_v61 }
  0xab   : > { %616 = vmatmul.f32.gmra.mxu3 %v443_v62 }
  0xac   : > { %527 = vmatmul.f32.gmra.mxu0 %v426_v1  ;;  %592 = vmatmul.f32.gmra.mxu1 %v427_v2 }
  0xb2   : > { %554 = vmatmul.f32.gmra.mxu2 %v444_v13 }
  0xb3   : > { %619 = vmatmul.f32.gmra.mxu3 %v445_v14 }
  0xb4   : > { %530 = vmatmul.f32.gmra.mxu0 %v428_v17  ;;  %595 = vmatmul.f32.gmra.mxu1 %v429_v18 }
  0xba   : > { %557 = vmatmul.f32.gmra.mxu2 %v446_v29 }
  0xbb   : > { %622 = vmatmul.f32.gmra.mxu3 %v447_v30  ;;  %v454_v30 = vld [vmem:[%s1501_s29 + $0x30] sm:$0xff] }
  0xbc   : > { %533 = vmatmul.f32.gmra.mxu0 %v430_v31  ;;  %598 = vmatmul.f32.gmra.mxu1 %v431_v32 }
 0x101   : > { %v513_v33 = vpop.f32.mrf.mxu0  ;;  %v578_v35 = vpop.f32.mrf.mxu1 }
 0x102   : > { %v579_v36 = vadd.f32 %v578_v35, %v513_v33  ;;  %v462_v35 = vld [vmem:[%s1501_s29 + $0x70] sm:$0xff] }
 0x104   : > { %v626_v37 = vadd.f32 %v579_v36, %v448_v34 }
 0x105   : > { %v537_v38 = vpop.f32.mrf.mxu2 }
 0x106   : > { %v602_v40 = vpop.f32.mrf.mxu3  ;;  %642 = vst [vmem:[%s1501_s29] sm:$0xff] %v626_v37 }
 0x107   : > { %v603_v41 = vadd.f32 %v602_v40, %v537_v38  ;;  %v455_v40 = vld [vmem:[%s1501_s29 + $0x38] sm:$0xff] }
 0x109   : > { %v634_v42 = vadd.f32 %v603_v41, %v456_v39  ;;  %v516_v43 = vpop.f32.mrf.mxu0  ;;  %v581_v45 = vpop.f32.mrf.mxu1 }
 0x10a   : > { %v582_v46 = vadd.f32 %v581_v45, %v516_v43  ;;  %v463_v45 = vld [vmem:[%s1501_s29 + $0x78] sm:$0xff] }
 0x10b   : > { %650 = vst [vmem:[%s1501_s29 + $0x40] sm:$0xff] %v634_v42 }
 0x10c   : > { %v627_v47 = vadd.f32 %v582_v46, %v449_v44 }
 0x10d   : > { %v540_v48 = vpop.f32.mrf.mxu2 }
 0x10e   : > { %v605_v50 = vpop.f32.mrf.mxu3  ;;  %643 = vst [vmem:[%s1501_s29 + $0x8] sm:$0xff] %v627_v47 }
 0x10f   : > { %v606_v51 = vadd.f32 %v605_v50, %v540_v48 }
 0x111   : > { %v635_v52 = vadd.f32 %v606_v51, %v457_v49  ;;  %v519_v53 = vpop.f32.mrf.mxu0  ;;  %v584_v55 = vpop.f32.mrf.mxu1 }
 0x112   : > { %v585_v56 = vadd.f32 %v584_v55, %v519_v53 }
 0x113   : > { %651 = vst [vmem:[%s1501_s29 + $0x48] sm:$0xff] %v635_v52 }
 0x114   : > { %v628_v57 = vadd.f32 %v585_v56, %v450_v54 }
 0x115   : > { %v543_v58 = vpop.f32.mrf.mxu2 }
 0x116   : > { %v608_v60 = vpop.f32.mrf.mxu3  ;;  %644 = vst [vmem:[%s1501_s29 + $0x10] sm:$0xff] %v628_v57 }
 0x117   : > { %v609_v61 = vadd.f32 %v608_v60, %v543_v58 }
 0x119   : > { %v636_v62 = vadd.f32 %v609_v61, %v458_v59  ;;  %v522_v63 = vpop.f32.mrf.mxu0  ;;  %v587_v1 = vpop.f32.mrf.mxu1 }
 0x11a   : > { %v588_v2 = vadd.f32 %v587_v1, %v522_v63 }
 0x11b   : > { %652 = vst [vmem:[%s1501_s29 + $0x50] sm:$0xff] %v636_v62 }
 0x11c   : > { %v629_v3 = vadd.f32 %v588_v2, %v451_v0 }
 0x11d   : > { %v546_v4 = vpop.f32.mrf.mxu2 }
 0x11e   : > { %v611_v6 = vpop.f32.mrf.mxu3  ;;  %645 = vst [vmem:[%s1501_s29 + $0x18] sm:$0xff] %v629_v3 }
 0x11f   : > { %v612_v7 = vadd.f32 %v611_v6, %v546_v4 }
 0x121   : > { %v637_v8 = vadd.f32 %v612_v7, %v459_v5  ;;  %v525_v9 = vpop.f32.mrf.mxu0  ;;  %v590_v11 = vpop.f32.mrf.mxu1 }
 0x122   : > { %v591_v12 = vadd.f32 %v590_v11, %v525_v9 }
 0x123   : > { %653 = vst [vmem:[%s1501_s29 + $0x58] sm:$0xff] %v637_v8 }
 0x124   : > { %v630_v13 = vadd.f32 %v591_v12, %v452_v10 }
 0x125   : > { %v549_v14 = vpop.f32.mrf.mxu2 }
 0x126   : > { %v614_v16 = vpop.f32.mrf.mxu3  ;;  %646 = vst [vmem:[%s1501_s29 + $0x20] sm:$0xff] %v630_v13 }
 0x127   : > { %v615_v17 = vadd.f32 %v614_v16, %v549_v14 }
 0x129   : > { %v638_v18 = vadd.f32 %v615_v17, %v460_v15  ;;  %v528_v19 = vpop.f32.mrf.mxu0  ;;  %v593_v21 = vpop.f32.mrf.mxu1 }
 0x12a   : > { %v594_v22 = vadd.f32 %v593_v21, %v528_v19 }
 0x12b   : > { %654 = vst [vmem:[%s1501_s29 + $0x60] sm:$0xff] %v638_v18 }
 0x12c   : > { %v631_v23 = vadd.f32 %v594_v22, %v453_v20 }
 0x12d   : > { %v552_v24 = vpop.f32.mrf.mxu2 }
 0x12e   : > { %v617_v26 = vpop.f32.mrf.mxu3  ;;  %647 = vst [vmem:[%s1501_s29 + $0x28] sm:$0xff] %v631_v23 }
 0x12f   : > { %v618_v27 = vadd.f32 %v617_v26, %v552_v24 }
 0x131   : > { %v639_v28 = vadd.f32 %v618_v27, %v461_v25  ;;  %v531_v29 = vpop.f32.mrf.mxu0  ;;  %v596_v31 = vpop.f32.mrf.mxu1 }
 0x132   : > { %v597_v32 = vadd.f32 %v596_v31, %v531_v29 }
 0x133   : > { %655 = vst [vmem:[%s1501_s29 + $0x68] sm:$0xff] %v639_v28 }
 0x134   : > { %v632_v33 = vadd.f32 %v597_v32, %v454_v30 }
 0x135   : > { %v555_v34 = vpop.f32.mrf.mxu2 }
 0x136   : > { %v620_v36 = vpop.f32.mrf.mxu3  ;;  %648 = vst [vmem:[%s1501_s29 + $0x30] sm:$0xff] %v632_v33 }
 0x137   : > { %v621_v37 = vadd.f32 %v620_v36, %v555_v34 }
 0x139   : > { %v640_v38 = vadd.f32 %v621_v37, %v462_v35  ;;  %v534_v39 = vpop.f32.mrf.mxu0  ;;  %v599_v41 = vpop.f32.mrf.mxu1 }
 0x13a   : > { %v600_v42 = vadd.f32 %v599_v41, %v534_v39 }
 0x13b   : > { %656 = vst [vmem:[%s1501_s29 + $0x70] sm:$0xff] %v640_v38 }
 0x13c   : > { %v633_v43 = vadd.f32 %v600_v42, %v455_v40 }
 0x13d   : > { %v558_v44 = vpop.f32.mrf.mxu2 }
 0x13e   : > { %v623_v46 = vpop.f32.mrf.mxu3  ;;  %649 = vst [vmem:[%s1501_s29 + $0x38] sm:$0xff] %v633_v43 }
 0x13f   : > { %v624_v47 = vadd.f32 %v623_v46, %v558_v44 }
 0x141   : > { %v641_v48 = vadd.f32 %v624_v47, %v463_v45 }
 0x143   : > { %657 = vst [vmem:[%s1501_s29 + $0x78] sm:$0xff] %v641_v48 }
 0x144   : > { %1130 = shalt.err (!%p1127_p12)
}
 0x145   : > { %s1263_s20 = smov 128   ;;  %s1264_s12 = smov 8  }
 0x146   : > { %877 = dma.vmem_to_hbm [thread:$0]  (%p1400_p13), %s672_s24, 2048, %s674_s5, %s659_s15, %s1263_s20, %s1263_s20, %s1264_s12  }
 0x147 PF: > { %s1723_s26 = sld [smem:[#allocation13_spill]]  ;;  %p894_p0 = scmp.ge.s32.totalorder %s1257_s25, 2 }
 0x149   : > { %p890_p1 = pnand %p894_p0, %p1408_p5 }
 0x14b   : > { %p891_p10 = pneg %p890_p1 }
 0x14d   : > { %s688_s29 = sand.u32 1, %s1723_s26  }
 0x14e   : > { %s689_s21 = scalar_lea.sflag [#allocation4], %s688_s29 }
 0x14f   : > { %1200 = dma.done.wait (%p891_p10), %s689_s21, 2048  }
 0x150   : > { %1202 = vsyncadd (%p891_p10), %s689_s21, 4294965248  ;;  %s22_s25 = sadd.s32 1, %s1257_s25   ;;  %s1726_s8 = sld [smem:[#allocation14_spill]] }
 0x151   : > { %p1638_p7 = scmp.ge.s32.totalorder %s22_s25, 6   ;;  %s1727_s14 = sld [smem:[#allocation20_spill]] }
 0x152   : > { %s1728_s30 = sld [smem:[#allocation15_spill]]  ;;  %s1733_s12 = smov %s1209_s13 }
 0x153   : > { %s1729_s20 = sld [smem:[#allocation21_spill]]  ;;  %s1735_s15 = smov %s1221_s16 }
 0x154   : > { %s1730_s22 = sld [smem:[#allocation17_spill]]  ;;  %s1736_s16 = smov %s1225_s17 }
 0x155   : > { %s1731_s24 = sld [smem:[#allocation18_spill]]  ;;  %s1737_s17 = smov %s1450_s18 }
 0x156   : > { %s1732_s4 = sld [smem:[#allocation19_spill]]  ;;  %s1734_s13 = smov %s1726_s8 }
 0x157   : > { %s1738_s18 = smov %s1233_s19  ;;  %s1740_s21 = smov %s1249_s23 }
 0x158   : > { %s1739_s19 = smov %s1728_s30  ;;  %21 = sbr.rel (!%p1638_p7) target bundleno = 15 (0xf), region = 105 }
 0x15b   : > { %s1741_s23 = smov %s1731_s24 }
 0x15c   : > { %s1742_s24 = smov %s1732_s4 }
 0x15d   :  { %695 = vsyncpa [#allocation3], 1 }
 0x15e   :  { %697 = vsyncpa [#allocation3 + $0x1], 1 }
 0x15f   :  { %698 = vsyncpa [#allocation6], 1 }
 0x160   :  { %700 = vsyncpa [#allocation6 + $0x1], 1 }
 0x161   :  { %701 = vsyncpa [#allocation4], 1 }
 0x162   :  { %703 = vsyncpa [#allocation4 + $0x1], 1 }

</bundles_post_ra>
